<compile_context>
chip_gen: v6e
topology: v6e:2x2x1
jax: 0.10.0
libtpu: 0.0.40
codegen_flags: <defaults>
</compile_context>

<pallas_src>
import math

import jax
import jax.numpy as jnp
from jax.experimental import pallas as pl
from jax.experimental.pallas import tpu as pltpu

_LANE = 128
_SUBLANE = 8
_MAX_TB = 1024          # rows per batch tile (double-buffered tiles stay ~MBs)
_NEG_BIG = -1e30        # finite "-inf" for padded action lanes (no inf-inf NaN)


def _round_up(n, m):
    return ((n + m - 1) // m) * m


def _choose_tile_b(B):
    """Batch tile: multiple of 8 sublanes; >= 2 grid steps when B allows it so
    v7x's two TensorCores both get work; capped at 1024 rows."""
    b8 = _round_up(B, _SUBLANE)
    if b8 == _SUBLANE:
        return b8                                   # grid=(1,) is unavoidable
    tb = _round_up(pl.cdiv(b8, 2), _SUBLANE)        # target >= 2 grid steps
    return min(tb, _MAX_TB)


def policy_net_kernel(x_ref, w1_ref, b1_ref, w2_ref, b2_ref, out_ref):
    # x:  (TB, S) f32      w1: (S, H_pad) bf16      b1: (1, H_pad) f32
    # w2: (H_pad, A_pad) bf16 (zero pad rows/cols)  b2: (1, A_pad) f32 (-1e30 pads)
    # out: (TB, A_pad) bf16  -- lane-dense store (A_pad == 128)
    x = x_ref[...].astype(jnp.bfloat16)             # f32 -> bf16 in-kernel (VPU pack)

    # fc1 + ReLU: bf16 MXU inputs, f32 accumulation.
    h = jnp.dot(x, w1_ref[...], preferred_element_type=jnp.float32) + b1_ref[...]
    h = jnp.maximum(h, 0.0)

    # fc2: bf16 MXU inputs, f32 accumulation.
    logits = (
        jnp.dot(h.astype(jnp.bfloat16), w2_ref[...],
                preferred_element_type=jnp.float32)
        + b2_ref[...]
    )

    # Numerically stable softmax over axis=1 (actions). Padded lanes hold
    # ~-1e30 so exp underflows to exactly 0 and contributes nothing.
    m = jnp.max(logits, axis=1, keepdims=True)
    e = jnp.exp(logits - m)
    denom = jnp.sum(e, axis=1, keepdims=True)
    out_ref[...] = (e * pl.reciprocal(denom, approx=True)).astype(out_ref.dtype)


def prepare_policy_params(w1, b1, w2, b2):
    """One-time parameter prep (hoisted out of the forward call):
    transpose torch-style (out, in) weights to (in, out), zero-pad the hidden
    dim and the action dim to full 128-lane widths, cast MXU operands to bf16."""
    H, S = w1.shape
    A = w2.shape[0]
    H_pad = _round_up(max(H, _LANE), _LANE)
    A_pad = _round_up(max(A, _LANE), _LANE)

    # fc1: zero columns beyond H -> h[:, H:] == ReLU(0) == 0.
    w1_p = jnp.zeros((S, H_pad), jnp.float32).at[:, :H].set(
        jnp.asarray(w1, jnp.float32).T).astype(jnp.bfloat16)               # (S, H_pad)
    b1_p = jnp.zeros((1, H_pad), jnp.float32).at[0, :H].set(
        jnp.asarray(b1, jnp.float32))                                      # (1, H_pad)

    # fc2: zero rows for padded H (contribute nothing), zero cols for padded A.
    w2_p = jnp.zeros((H_pad, A_pad), jnp.float32).at[:H, :A].set(
        jnp.asarray(w2, jnp.float32).T).astype(jnp.bfloat16)               # (H_pad, A_pad)
    b2_p = jnp.full((1, A_pad), _NEG_BIG, jnp.float32).at[0, :A].set(
        jnp.asarray(b2, jnp.float32))                                      # (1, A_pad)

    return {"w1": w1_p, "b1": b1_p, "w2": w2_p, "b2": b2_p,
            "S": S, "H": H, "H_pad": H_pad, "A": A, "A_pad": A_pad}


def policy_net_forward(x, params, *, return_padded=False):
    """x: (B, S) float; params from prepare_policy_params.
    Returns (B, A) bf16 probs, or the raw (B_pad, A_pad) bf16 block if
    return_padded=True (padded lanes are exactly 0, padded rows are discardable)."""
    B, S = x.shape
    assert S == params["S"], "state_dim mismatch"
    H_pad, A, A_pad = params["H_pad"], params["A"], params["A_pad"]

    TB = _choose_tile_b(B)
    B_pad = _round_up(B, TB)

    x_f = x if x.dtype == jnp.float32 else jnp.asarray(x, jnp.float32)
    if B_pad != B:
        x_f = jnp.pad(x_f, ((0, B_pad - B), (0, 0)))

    grid = (B_pad // TB,)

    out = pl.pallas_call(
        policy_net_kernel,
        out_shape=jax.ShapeDtypeStruct((B_pad, A_pad), jnp.bfloat16),
        grid=grid,
        in_specs=[
            pl.BlockSpec((TB, S), lambda i: (i, 0)),        # x: tiled over batch
            pl.BlockSpec((S, H_pad), lambda i: (0, 0)),     # W1: VMEM-resident
            pl.BlockSpec((1, H_pad), lambda i: (0, 0)),     # b1: VMEM-resident
            pl.BlockSpec((H_pad, A_pad), lambda i: (0, 0)), # W2: VMEM-resident
            pl.BlockSpec((1, A_pad), lambda i: (0, 0)),     # b2: VMEM-resident
        ],
        out_specs=pl.BlockSpec((TB, A_pad), lambda i: (i, 0)),
        compiler_params=pltpu.CompilerParams(
            dimension_semantics=("parallel",),  # shard batch tiles across TCs
        ),
    )(x_f, params["w1"], params["b1"], params["w2"], params["b2"])

    if return_padded:
        return out
    return out[:B, :A]


def _init_params(key, state_dim, hidden_dim, action_dim):
    """Deterministic orthogonal(std=sqrt(2)) weights, zero biases (torch _layer_init)."""
    k1, k2 = jax.random.split(key)
    ortho = jax.nn.initializers.orthogonal(scale=math.sqrt(2.0))
    # torch Linear weight shape is (out_features, in_features)
    w1 = ortho(k1, (hidden_dim, state_dim), jnp.float32)
    b1 = jnp.zeros((hidden_dim,), jnp.float32)
    w2 = ortho(k2, (action_dim, hidden_dim), jnp.float32)
    b2 = jnp.zeros((action_dim,), jnp.float32)
    return w1, b1, w2, b2


def _reference_forward_f32(x, w1, b1, w2, b2):
    h = jax.nn.relu(x @ w1.T + b1)
    return jax.nn.softmax(h @ w2.T + b2, axis=1)


def _reference_forward_bf16(x, w1, b1, w2, b2):
    # Matches the kernel's matmul numerics (bf16 MXU inputs, f32 accumulation).
    xb = jnp.asarray(x, jnp.float32).astype(jnp.bfloat16)
    w1b = jnp.asarray(w1, jnp.float32).T.astype(jnp.bfloat16)
    w2b = jnp.asarray(w2, jnp.float32).T.astype(jnp.bfloat16)
    h = jax.nn.relu(jnp.dot(xb, w1b, preferred_element_type=jnp.float32) + b1)
    logits = jnp.dot(h.astype(jnp.bfloat16), w2b, preferred_element_type=jnp.float32) + b2
    return jax.nn.softmax(logits, axis=1)


if __name__ == "__main__":
    # Small shapes implied by the module: (batch, state_dim) input.
    # NOTE: at these toy shapes the kernel is launch/DMA-overhead bound; in a
    # real RL loop stack many environments/timesteps into B before calling.
    batch, state_dim, hidden_dim, action_dim = 8, 16, 32, 4

    key = jax.random.PRNGKey(0)
    kx, kp = jax.random.split(key)
    x = jax.random.normal(kx, (batch, state_dim), jnp.float32)
    w1, b1, w2, b2 = _init_params(kp, state_dim, hidden_dim, action_dim)

    params = prepare_policy_params(w1, b1, w2, b2)   # one-time prep
    out = policy_net_forward(x, params)
    out = jax.block_until_ready(out)

    assert out.shape == (batch, action_dim)
    out_f32 = jnp.asarray(out, jnp.float32)

    # Structural check against a reference with matching bf16 matmul numerics.
    ref_bf16 = _reference_forward_bf16(x, w1, b1, w2, b2)
    assert jnp.allclose(out_f32, ref_bf16, atol=1.5e-2, rtol=1.5e-2), \
        "mismatch vs bf16 reference"

    # Looser end-to-end check against the full-f32 torch-equivalent reference.
    ref_f32 = _reference_forward_f32(x, w1, b1, w2, b2)
    assert jnp.allclose(out_f32, ref_f32, atol=3e-2, rtol=3e-2), \
        "mismatch vs f32 reference"

    # Probabilities must (approximately) normalize per row
    # (bf16 storage + approximate reciprocal => ~1e-2 tolerance).
    assert jnp.allclose(jnp.sum(out_f32, axis=1), 1.0, atol=1e-2), \
        "softmax rows must sum to 1"

    print("KERNEL_OK")
</pallas_src>

<mosaic_0001>
module attributes {stable_mosaic.version = 11 : i64} {
  func.func @policy_net_kernel(%arg0: i32, %arg1: memref<8x16xf32, #tpu.memory_space<vmem>>, %arg2: memref<16x128xbf16, #tpu.memory_space<vmem>>, %arg3: memref<1x128xf32, #tpu.memory_space<vmem>>, %arg4: memref<128x128xbf16, #tpu.memory_space<vmem>>, %arg5: memref<1x128xf32, #tpu.memory_space<vmem>>, %arg6: memref<8x128xbf16, #tpu.memory_space<vmem>>) attributes {dimension_semantics = [#tpu.dimension_semantics<parallel>], iteration_bounds = array<i64: 1>, scalar_prefetch = 0 : i64, scratch_operands = 0 : i64, tpu.core_type = #tpu.core_type<tc>, window_params = [{transform_indices = @transform_0, window_bounds = array<i64: 8, 16>}, {pipeline_mode = #tpu.pipeline_mode<synchronous>, transform_indices = @transform_1, window_bounds = array<i64: 16, 128>}, {pipeline_mode = #tpu.pipeline_mode<synchronous>, transform_indices = @transform_2, window_bounds = array<i64: 1, 128>}, {pipeline_mode = #tpu.pipeline_mode<synchronous>, transform_indices = @transform_3, window_bounds = array<i64: 128, 128>}, {pipeline_mode = #tpu.pipeline_mode<synchronous>, transform_indices = @transform_4, window_bounds = array<i64: 1, 128>}, {transform_indices = @transform_5, window_bounds = array<i64: 8, 128>}]} {
    %c0 = arith.constant 0 : index
    %c0_0 = arith.constant 0 : index
    %0 = vector.load %arg1[%c0, %c0_0] : memref<8x16xf32, #tpu.memory_space<vmem>>, vector<8x16xf32>
    %1 = arith.truncf %0 : vector<8x16xf32> to vector<8x16xbf16>
    %c0_1 = arith.constant 0 : index
    %c0_2 = arith.constant 0 : index
    %2 = vector.load %arg2[%c0_1, %c0_2] : memref<16x128xbf16, #tpu.memory_space<vmem>>, vector<16x128xbf16>
    %cst = arith.constant dense<0.000000e+00> : vector<8x128xf32>
    %3 = tpu.matmul %1, %2, %cst {dimension_numbers = #tpu.dot_dimension_numbers<[1], [0], [0], [1], [0, 0, 1, 1], [], []>} : vector<8x16xbf16>, vector<16x128xbf16>, vector<8x128xf32> -> vector<8x128xf32>
    %c0_3 = arith.constant 0 : index
    %c0_4 = arith.constant 0 : index
    %4 = vector.load %arg3[%c0_3, %c0_4] : memref<1x128xf32, #tpu.memory_space<vmem>>, vector<1x128xf32>
    %5 = vector.broadcast %4 : vector<1x128xf32> to vector<8x128xf32>
    %6 = arith.addf %3, %5 : vector<8x128xf32>
    %cst_5 = arith.constant 0.000000e+00 : f32
    %7 = vector.broadcast %cst_5 : f32 to vector<8x128xf32>
    %8 = arith.maximumf %6, %7 : vector<8x128xf32>
    %9 = arith.truncf %8 : vector<8x128xf32> to vector<8x128xbf16>
    %c0_6 = arith.constant 0 : index
    %c0_7 = arith.constant 0 : index
    %10 = vector.load %arg4[%c0_6, %c0_7] : memref<128x128xbf16, #tpu.memory_space<vmem>>, vector<128x128xbf16>
    %cst_8 = arith.constant dense<0.000000e+00> : vector<8x128xf32>
    %11 = tpu.matmul %9, %10, %cst_8 {dimension_numbers = #tpu.dot_dimension_numbers<[1], [0], [0], [1], [0, 0, 1, 1], [], []>} : vector<8x128xbf16>, vector<128x128xbf16>, vector<8x128xf32> -> vector<8x128xf32>
    %c0_9 = arith.constant 0 : index
    %c0_10 = arith.constant 0 : index
    %12 = vector.load %arg5[%c0_9, %c0_10] : memref<1x128xf32, #tpu.memory_space<vmem>>, vector<1x128xf32>
    %13 = vector.broadcast %12 : vector<1x128xf32> to vector<8x128xf32>
    %14 = arith.addf %11, %13 : vector<8x128xf32>
    %cst_11 = arith.constant dense<0xFF800000> : vector<8xf32>
    %15 = vector.multi_reduction <maximumf>, %14, %cst_11 [1] : vector<8x128xf32> to vector<8xf32>
    %16 = vector.shape_cast %15 : vector<8xf32> to vector<8x1xf32>
    %17 = vector.broadcast %16 : vector<8x1xf32> to vector<8x128xf32>
    %18 = arith.subf %14, %17 : vector<8x128xf32>
    %19 = math.exp %18 : vector<8x128xf32>
    %cst_12 = arith.constant dense<0.000000e+00> : vector<8xf32>
    %20 = vector.multi_reduction <add>, %19, %cst_12 [1] : vector<8x128xf32> to vector<8xf32>
    %21 = vector.shape_cast %20 : vector<8xf32> to vector<8x1xf32>
    %22 = tpu.reciprocal %21 {approx = true} : vector<8x1xf32> -> vector<8x1xf32>
    %23 = vector.broadcast %22 : vector<8x1xf32> to vector<8x128xf32>
    %24 = arith.mulf %19, %23 : vector<8x128xf32>
    %25 = arith.truncf %24 : vector<8x128xf32> to vector<8x128xbf16>
    %c0_13 = arith.constant 0 : index
    %c0_14 = arith.constant 0 : index
    %26 = vector.load %arg6[%c0_13, %c0_14] : memref<8x128xbf16, #tpu.memory_space<vmem>>, vector<8x128xbf16>
    tpu.vector_store %arg6[%c0_13, %c0_14], %25 {strides = array<i32>} : memref<8x128xbf16, #tpu.memory_space<vmem>>, vector<8x128xbf16>,
    return
  }
  func.func @transform_0(%arg0: i32) -> (i32, i32) {
    %c0_i32 = arith.constant 0 : i32
    %c0_i32_0 = arith.constant 0 : i32
    return %arg0, %c0_i32 : i32, i32
  }
  func.func @transform_1(%arg0: i32) -> (i32, i32) {
    %c0_i32 = arith.constant 0 : i32
    %c0_i32_0 = arith.constant 0 : i32
    %c0_i32_1 = arith.constant 0 : i32
    return %c0_i32, %c0_i32_0 : i32, i32
  }
  func.func @transform_2(%arg0: i32) -> (i32, i32) {
    %c0_i32 = arith.constant 0 : i32
    %c0_i32_0 = arith.constant 0 : i32
    %c0_i32_1 = arith.constant 0 : i32
    return %c0_i32, %c0_i32_0 : i32, i32
  }
  func.func @transform_3(%arg0: i32) -> (i32, i32) {
    %c0_i32 = arith.constant 0 : i32
    %c0_i32_0 = arith.constant 0 : i32
    %c0_i32_1 = arith.constant 0 : i32
    return %c0_i32, %c0_i32_0 : i32, i32
  }
  func.func @transform_4(%arg0: i32) -> (i32, i32) {
    %c0_i32 = arith.constant 0 : i32
    %c0_i32_0 = arith.constant 0 : i32
    %c0_i32_1 = arith.constant 0 : i32
    return %c0_i32, %c0_i32_0 : i32, i32
  }
  func.func @transform_5(%arg0: i32) -> (i32, i32) {
    %c0_i32 = arith.constant 0 : i32
    %c0_i32_0 = arith.constant 0 : i32
    return %arg0, %c0_i32 : i32, i32
  }
}

</mosaic_0001>

<bundles_post_ra>
// kernel: tpu_custom_call.1
= control target key start
LH: loop header
LB: loop body
LE: loop exit
PB: predicated region body
PF: predicated region fallthrough
CT: control target
= control target key end

     0   :  { %10 = vsyncpa [#allocation3], 0  ;;  %s474_s0 = inlined_call_operand.hbm [shape: f32[8,16], index: 0, kind: input, shape index: {}]   ;;  %s475_s1 = inlined_call_operand.hbm [shape: bf16[16,128], index: 1, kind: input, shape index: {}]   ;;  %s476_s2 = inlined_call_operand.vmem [shape: f32[1,128], index: 2, kind: input, shape index: {}]   ;;  %s477_s3 = inlined_call_operand.hbm [shape: bf16[128,128], index: 3, kind: input, shape index: {}]   ;;  %s478_s4 = inlined_call_operand.vmem [shape: f32[1,128], index: 4, kind: input, shape index: {}]   ;;  %s479_s5 = inlined_call_operand.hbm [shape: bf16[8,128], index: 5, kind: output, shape index: {}]  }
   0x1   :  { %11 = vsyncpa [#allocation6], 0 }
   0x2   :  { %12 = vsyncpa [#allocation4], 0  ;;  %s418_s18 = smov [#allocation5]  }
   0x3   :  { %s28_s19 = sshll.u32 %s418_s18, 4  ;;  %s29_s19 = int_to_ptr.vmem [resolvable:$true] %s28_s19 }
   0x4   :  { %s340_s20 = scalar_lea.vmem %s29_s19, 128  ;;  %p345_p1 = scmp.lt.s32.totalorder %s29_s19, %s29_s19 }
   0x5   :  { %p341_p0 = scmp.ne.s32.totalorder %s29_s19, %s340_s20  ;;  %p346_p2 = scmp.lt.s32.totalorder %s340_s20, %s340_s20 }
   0x7   :  { %p347_p3 = por %p346_p2, %p345_p1 }
   0x9   :  { %p348_p4 = pnand %p347_p3, %p341_p0 }
   0xb   :  { %351 = shalt.err (!%p348_p4)
}
   0xc   :  { %s419_s21 = smov 64   ;;  %s420_s22 = smov 4  }
   0xd   :  { %34 = dma.hbm_to_vmem [thread:$0]  %s475_s1, 128, %s29_s19, [#allocation6], %s419_s21, %s419_s21, %s420_s22  }
   0xe   :  { %s421_s25 = smov [#allocation2]   ;;  %s422_s27 = smov [#allocation7]  }
   0xf   :  { %s19_s26 = sshll.u32 %s421_s25, 4  ;;  %s42_s28 = sshll.u32 %s422_s27, 4  ;;  %s20_s26 = int_to_ptr.vmem [resolvable:$true] %s19_s26  ;;  %s43_s28 = int_to_ptr.vmem [resolvable:$true] %s42_s28 }
  0x10   :  { %s360_s29 = scalar_lea.vmem %s20_s26, 128  ;;  %p365_p6 = scmp.lt.s32.totalorder %s20_s26, %s20_s26 }
  0x11   :  { %p361_p5 = scmp.ne.s32.totalorder %s20_s26, %s360_s29  ;;  %p366_p7 = scmp.lt.s32.totalorder %s360_s29, %s360_s29 }
  0x13   :  { %p367_p8 = por %p366_p7, %p365_p6 }
  0x15   :  { %p368_p9 = pnand %p367_p8, %p361_p5 }
  0x17   :  { %371 = shalt.err (!%p368_p9)
}
  0x18   :  { %22 = dma.hbm_to_vmem [thread:$0]  %s474_s0, 128, %s20_s26, [#allocation3]  }
  0x19   :  { %s380_s7 = scalar_lea.vmem %s43_s28, 1024  ;;  %p385_p11 = scmp.lt.s32.totalorder %s43_s28, %s43_s28 }
  0x1a   :  { %p381_p10 = scmp.ne.s32.totalorder %s43_s28, %s380_s7  ;;  %p386_p12 = scmp.lt.s32.totalorder %s380_s7, %s380_s7 }
  0x1c   :  { %p387_p13 = por %p386_p12, %p385_p11 }
  0x1e   :  { %p388_p0 = pnand %p387_p13, %p381_p10 }
  0x20   :  { %391 = shalt.err (!%p388_p0)
}
  0x21   :  { %48 = dma.hbm_to_vmem [thread:$0]  %s477_s3, 1024, %s43_s28, [#allocation6], %s419_s21, %s419_s21, %s420_s22  }
  0x22   :  { %412 = dma.done.wait [#allocation3], 128  }
  0x23   :  { %413 = vsyncadd [#allocation3], 4294967168 }
  0x24   :  { %414 = dma.done.wait [#allocation6], 1152  }
  0x25   :  { %415 = vsyncadd [#allocation6], 4294966144  ;;  %v423_v0 = vmov 0.0   ;;  %vm424_vm0 = vmmov 0   ;;  %v319_v1 = vld [vmem:[#allocation5] sm:$0xff]   ;;  %v61_v2 = vld [vmem:[#allocation2] sm:$0xff] }
  0x26   :  { %285 = vmatprep.subr.bf16.mxu0 %v423_v0  ;;  %287 = vmatprep.mubr.msk.bf16.mxu0 %vm424_vm0, %v423_v0  ;;  %v62_v3 = vpack.c.bf16 %v61_v2, %v61_v2  ;;  %vm78_vm1 = vcmask 130048   ;;  %v320_v4 = vld [vmem:[#allocation7 + $0x38] sm:$0xff]   ;;  %v321_v5 = vld [vmem:[#allocation7 + $0x30] sm:$0xff]   ;;  %v322_v6 = vld [vmem:[#allocation7 + $0x28] sm:$0xff]  }
  0x27   :  { %291 = vmatprep.subr.bf16.mxu1 %v423_v0  ;;  %307 = vmatprep.mubr.msk.bf16.mxu1 %vm424_vm0, %v423_v0  ;;  %v323_v7 = vld [vmem:[#allocation7 + $0x20] sm:$0xff]   ;;  %v324_v8 = vld [vmem:[#allocation7 + $0x18] sm:$0xff]   ;;  %v325_v9 = vld [vmem:[#allocation7 + $0x10] sm:$0xff]  }
  0x28   :  { %286 = vmatpush3.bf16.msra.mxu0 %v319_v1  ;;  %292 = vmatpush3.bf16.msra.mxu1 %v320_v4  ;;  %v326_v10 = vld [vmem:[#allocation7 + $0x8] sm:$0xff]   ;;  %v327_v11 = vld [vmem:[#allocation7] sm:$0xff]   ;;  %v262_v12 = vld [vmem:[%s476_s2] ss:$0 sm:$0xff]  ;;  %s425_s2 = smov [#allocation8]  }
  0x29   :  { %293 = vmatprep.subr.bf16.mxu1 %v423_v0  ;;  %v265_v20 = vld [vmem:[%s478_s4] ss:$0 sm:$0xff]  ;;  %s252_s11 = sshll.u32 %s425_s2, 4  ;;  %s253_s11 = int_to_ptr.vmem [resolvable:$true] %s252_s11 }
  0x2a   :  { %s392_s4 = scalar_lea.vmem %s253_s11, 64  ;;  %p397_p2 = scmp.lt.s32.totalorder %s253_s11, %s253_s11 }
  0x2b   :  { %288 = vmatmul.mubr.msk.bf16.vlgmr.msra.gmra.mxu0 %vm78_vm1, %v62_v3  ;;  %p393_p1 = scmp.ne.s32.totalorder %s253_s11, %s392_s4  ;;  %p398_p3 = scmp.lt.s32.totalorder %s392_s4, %s392_s4 }
  0x2c   :  { %294 = vmatpush3.bf16.msra.mxu1 %v321_v5 }
  0x2d   :  { %295 = vmatprep.subr.bf16.mxu1 %v423_v0  ;;  %p399_p4 = por %p398_p3, %p397_p2 }
  0x2f   :  { %p400_p5 = pnand %p399_p4, %p393_p1 }
  0x30   :  { %296 = vmatpush3.bf16.msra.mxu1 %v322_v6 }
  0x31   :  { %297 = vmatprep.subr.bf16.mxu1 %v423_v0 }
  0x34   :  { %298 = vmatpush3.bf16.msra.mxu1 %v323_v7 }
  0x35   :  { %299 = vmatprep.subr.bf16.mxu1 %v423_v0 }
  0x38   :  { %300 = vmatpush3.bf16.msra.mxu1 %v324_v8 }
  0x39   :  { %301 = vmatprep.subr.bf16.mxu1 %v423_v0 }
  0x3c   :  { %302 = vmatpush3.bf16.msra.mxu1 %v325_v9 }
  0x3d   :  { %303 = vmatprep.subr.bf16.mxu1 %v423_v0 }
  0x40   :  { %304 = vmatpush3.bf16.msra.mxu1 %v326_v10 }
  0x41   :  { %305 = vmatprep.subr.bf16.mxu1 %v423_v0 }
  0x44   :  { %306 = vmatpush3.bf16.msra.mxu1 %v327_v11 }
  0xeb   :  { %v116_v13 = vpop.f32.mrf.mxu0 }
  0xec   :  { %v117_v14 = vadd.f32 %v262_v12, %v116_v13 }
  0xed   :  { %v289_v15 = vpop.f32.mrf.mxu0 }
  0xee   :  { %v122_v16 = vmax.f32 %v117_v14, 0.0 }
  0xef   :  { %v119_v17 = vpop.f32.mrf.mxu0 }
  0xf0   :  { %v123_v18 = vpack.c.bf16 %v122_v16, %v122_v16 }
  0xf1   :  { %v290_v19 = vpop.f32.mrf.mxu0 }
  0xf2   :  { %308 = vmatmul.mubr.bf16.vlgmr.msra.gmra.mxu1 %v123_v18 }
 0x1b2   :  { %v229_v21 = vpop.f32.mrf.mxu1 }
 0x1b3   :  { %v230_v22 = vadd.f32 %v265_v20, %v229_v21 }
 0x1b4   :  { %v309_v23 = vpop.f32.mrf.mxu1 }
 0x1b5   :  { %235 = vmax.xlane.f32.xlu0 %v230_v22 }
 0x1b6   :  { %v232_v24 = vpop.f32.mrf.mxu1 }
 0x1b8   :  { %v310_v25 = vpop.f32.mrf.mxu1 }
 0x23e   :  { %v236_v26 = vpop.xlane.xlu0 %235 }
 0x23f   :  { %v237_v27 = vsub.f32 %v230_v22, %v236_v26 }
 0x241   :  { %v238_v28 = vmul.f32 1.442695, %v237_v27 }
 0x243   :  { %328 = vpow2.f32 %v238_v28 }
 0x250   :  { %v329_v29 = vpop.eup %328 }
 0x251   :  { %240 = vadd.xlane.f32.xlu0 %v329_v29 }
 0x2da   :  { %v241_v30 = vpop.xlane.xlu0 %240 }
 0x2db   :  { %330 = vrcp.f32 %v241_v30 }
 0x2e8   :  { %v331_v31 = vpop.eup %330 }
 0x2e9   :  { %v243_v32 = vmul.f32 %v331_v31, %v329_v29 }
 0x2eb   :  { %v244_v33 = vpack.c.bf16 %v243_v32, %v243_v32 }
 0x2ed   :  { %245 = vst [vmem:[#allocation8] sm:$0xf] %v244_v33 }
 0x2ee   :  { %403 = shalt.err (!%p400_p5)
}
 0x2ef   :  { %255 = dma.vmem_to_hbm [thread:$0]  %s253_s11, 64, %s479_s5, [#allocation4]  }
 0x2f0   :  { %416 = dma.done.wait [#allocation4], 64  }
 0x2f1   :  { %417 = vsyncadd [#allocation4], 4294967232 }
 0x2f2   :  { %259 = vsyncpa [#allocation3], 1 }
 0x2f3   :  { %260 = vsyncpa [#allocation6], 1 }
 0x2f4   :  { %261 = vsyncpa [#allocation4], 1 }

</bundles_post_ra>
